<compile_context>
chip_gen: v7x
topology: tpu7x:2x2x1
jax: 0.10.0
libtpu: 0.0.40
codegen_flags: <defaults>
</compile_context>

<pallas_src>
import jax
import jax.numpy as jnp
from jax.experimental import pallas as pl
from jax.experimental.pallas import tpu as pltpu


def _round_up(x: int, m: int) -> int:
    return (x + m - 1) // m * m


def patch_embed_kernel(p_ref, w_ref, b_ref, o_ref):
    # (tm, K)bf16 @ (K, E)bf16 on the MXU, f32 accumulation, bias add in f32.
    acc = jnp.dot(p_ref[...], w_ref[...], preferred_element_type=jnp.float32)
    o_ref[...] = (acc + b_ref[...]).astype(o_ref.dtype)


def patch_embed(images, weight, bias, patch_size, *, out_dtype=None,
                tm_max=1024, compute_dtype=jnp.bfloat16,
                vmem_budget_bytes=40 * 1024 * 1024,
                vmem_limit_bytes=48 * 1024 * 1024):
    """images: (B, C, H, W); weight: (K, E) with K = C*patch_size**2 (nn.Linear
    weight transposed); bias: (E,).  Returns (B, h*w, E) in out_dtype (defaults to
    images.dtype; pass jnp.bfloat16 to halve the output HBM stream)."""
    B, C, H, W = images.shape
    ph = pw = patch_size
    h, w = H // ph, W // pw
    K = C * ph * pw
    E = weight.shape[1]
    M = B * h * w
    out_dtype = images.dtype if out_dtype is None else out_dtype
    out_itemsize = jnp.dtype(out_dtype).itemsize
    cd_itemsize = jnp.dtype(compute_dtype).itemsize

    # einops 'b c (h ph) (w pw) -> b (h w) (c ph pw)' as JAX glue; cast placed before
    # the transpose so XLA fuses it and the materialized patches tensor is bf16.
    x = images.astype(compute_dtype)
    patches = x.reshape(B, C, h, ph, w, pw)
    patches = patches.transpose(0, 2, 4, 1, 3, 5).reshape(M, K)

    w_c = weight.astype(compute_dtype)
    b_row = bias.astype(jnp.float32).reshape(1, E)

    # ---- Row-tile selection ---------------------------------------------------
    # tm: multiple of 16, as large as possible (fewer grid steps, bigger DMAs), but
    #   (a) >= 2 grid steps whenever M >= 32 (v7x has 2 TensorCores sharing the
    #       "parallel" grid axis),
    #   (b) double-buffered activation + output tiles plus the single-buffered
    #       resident weight fit the VMEM budget (v7x has only 64 MiB per TC).
    tm = min(tm_max, _round_up(M, 16))
    if M >= 32:
        tm = min(tm, _round_up(pl.cdiv(M, 2), 16))
    resident = K * E * cd_itemsize + 2 * E * 4               # weight (1 buf) + bias
    per_row = 2 * K * cd_itemsize + 2 * E * out_itemsize     # act + out, double-buffered
    tm_budget = max(16, (vmem_budget_bytes - resident) // per_row // 16 * 16)
    tm = max(16, min(tm, tm_budget))
    if tm >= M:
        tm = M            # single full-extent block (always a legal block shape)
    grid = (pl.cdiv(M, tm),)

    cost = pl.CostEstimate(
        flops=2 * M * K * E,
        transcendentals=0,
        bytes_accessed=(M * K * cd_itemsize        # bf16 patches (activations)
                        + K * E * cd_itemsize      # weight, read once
                        + E * 4                    # bias
                        + M * E * out_itemsize),   # output
    )

    out = pl.pallas_call(
        patch_embed_kernel,
        out_shape=jax.ShapeDtypeStruct((M, E), out_dtype),
        grid_spec=pltpu.PrefetchScalarGridSpec(
            num_scalar_prefetch=0,
            grid=grid,
            in_specs=[
                # Activation tile: pipelined over the M grid axis; ragged final
                # block is masked by Pallas (rows independent).
                pl.BlockSpec((tm, K), lambda i: (i, 0)),
                # Weight: constant index_map + single buffer -> DMA'd once,
                # VMEM-resident, no second K*E*2-byte buffer reserved.
                pl.BlockSpec((K, E), lambda i: (0, 0),
                             pipeline_mode=pl.Buffered(buffer_count=1)),
                # Bias row: constant index_map + single buffer.
                pl.BlockSpec((1, E), lambda i: (0, 0),
                             pipeline_mode=pl.Buffered(buffer_count=1)),
            ],
            out_specs=pl.BlockSpec((tm, E), lambda i: (i, 0)),
        ),
        compiler_params=pltpu.CompilerParams(
            dimension_semantics=("parallel",),
            vmem_limit_bytes=vmem_limit_bytes,
        ),
        cost_estimate=cost,
    )(patches, w_c, b_row)

    return out.reshape(B, h * w, E)


if __name__ == "__main__":
    # Small, module-consistent shapes, chosen so the run exercises both the
    # >=2-step parallel grid and the ragged (masked) final block:
    #   B=2, C=3, H=W=40, patch=8 -> h=w=5, M=50 patches, K=192, E=128
    #   tm resolves to 32 -> grid=(2,); last block has 18 valid rows of 32.
    B, C, H, W = 2, 3, 40, 40
    patch_size = 8
    embed_dim = 128
    K = C * patch_size * patch_size  # 192

    key = jax.random.PRNGKey(0)
    k_img, k_w, k_b = jax.random.split(key, 3)

    images = jax.random.normal(k_img, (B, C, H, W), dtype=jnp.float32)
    # nn.Linear(in=K, out=E): y = x @ W.T + b ; weight passed pre-transposed as (K, E).
    weight = jax.random.normal(k_w, (K, embed_dim), dtype=jnp.float32) * (1.0 / K ** 0.5)
    bias = jax.random.normal(k_b, (embed_dim,), dtype=jnp.float32) * 0.01

    out = patch_embed(images, weight, bias, patch_size)
    out = jax.block_until_ready(out)

    # Pure-JAX f32 reference (kernel computes in bf16 with f32 accumulation,
    # hence the looser tolerance).
    h_p, w_p = H // patch_size, W // patch_size
    p = images.reshape(B, C, h_p, patch_size, w_p, patch_size)
    p = p.transpose(0, 2, 4, 1, 3, 5).reshape(B, -1, K)
    ref = p @ weight + bias

    assert out.shape == (B, h_p * w_p, embed_dim)
    assert jnp.allclose(out, ref, atol=5e-2, rtol=5e-2), \
        float(jnp.max(jnp.abs(out - ref)))

    print("KERNEL_OK")
</pallas_src>

<mosaic_0001>
module attributes {stable_mosaic.version = 11 : i64} {
  func.func @patch_embed_kernel(%arg0: i32, %arg1: memref<32x192xbf16, #tpu.memory_space<vmem>>, %arg2: memref<192x128xbf16, #tpu.memory_space<vmem>>, %arg3: memref<1x128xf32, #tpu.memory_space<vmem>>, %arg4: memref<32x128xf32, #tpu.memory_space<vmem>>) attributes {dimension_semantics = [#tpu.dimension_semantics<parallel>], iteration_bounds = array<i64: 2>, scalar_prefetch = 0 : i64, scratch_operands = 0 : i64, tpu.core_type = #tpu.core_type<tc>, window_params = [{transform_indices = @transform_0, window_bounds = array<i64: 32, 192>}, {pipeline_mode = #tpu.pipeline_mode<synchronous>, transform_indices = @transform_1, window_bounds = array<i64: 192, 128>}, {pipeline_mode = #tpu.pipeline_mode<synchronous>, transform_indices = @transform_2, window_bounds = array<i64: 1, 128>}, {transform_indices = @transform_3, window_bounds = array<i64: 32, 128>}]} {
    %c0 = arith.constant 0 : index
    %c0_0 = arith.constant 0 : index
    %0 = vector.load %arg1[%c0, %c0_0] : memref<32x192xbf16, #tpu.memory_space<vmem>>, vector<32x192xbf16>
    %c0_1 = arith.constant 0 : index
    %c0_2 = arith.constant 0 : index
    %1 = vector.load %arg2[%c0_1, %c0_2] : memref<192x128xbf16, #tpu.memory_space<vmem>>, vector<192x128xbf16>
    %cst = arith.constant dense<0.000000e+00> : vector<32x128xf32>
    %2 = tpu.matmul %0, %1, %cst {dimension_numbers = #tpu.dot_dimension_numbers<[1], [0], [0], [1], [0, 0, 1, 1], [], []>} : vector<32x192xbf16>, vector<192x128xbf16>, vector<32x128xf32> -> vector<32x128xf32>
    %c0_3 = arith.constant 0 : index
    %c0_4 = arith.constant 0 : index
    %3 = vector.load %arg3[%c0_3, %c0_4] : memref<1x128xf32, #tpu.memory_space<vmem>>, vector<1x128xf32>
    %4 = vector.broadcast %3 : vector<1x128xf32> to vector<32x128xf32>
    %5 = arith.addf %2, %4 : vector<32x128xf32>
    %c0_5 = arith.constant 0 : index
    %c0_6 = arith.constant 0 : index
    %6 = vector.load %arg4[%c0_5, %c0_6] : memref<32x128xf32, #tpu.memory_space<vmem>>, vector<32x128xf32>
    tpu.vector_store %arg4[%c0_5, %c0_6], %5 {strides = array<i32>} : memref<32x128xf32, #tpu.memory_space<vmem>>, vector<32x128xf32>,
    return
  }
  func.func @transform_0(%arg0: i32) -> (i32, i32) {
    %c0_i32 = arith.constant 0 : i32
    %c0_i32_0 = arith.constant 0 : i32
    return %arg0, %c0_i32 : i32, i32
  }
  func.func @transform_1(%arg0: i32) -> (i32, i32) {
    %c0_i32 = arith.constant 0 : i32
    %c0_i32_0 = arith.constant 0 : i32
    %c0_i32_1 = arith.constant 0 : i32
    return %c0_i32, %c0_i32_0 : i32, i32
  }
  func.func @transform_2(%arg0: i32) -> (i32, i32) {
    %c0_i32 = arith.constant 0 : i32
    %c0_i32_0 = arith.constant 0 : i32
    %c0_i32_1 = arith.constant 0 : i32
    return %c0_i32, %c0_i32_0 : i32, i32
  }
  func.func @transform_3(%arg0: i32) -> (i32, i32) {
    %c0_i32 = arith.constant 0 : i32
    %c0_i32_0 = arith.constant 0 : i32
    return %arg0, %c0_i32 : i32, i32
  }
}

</mosaic_0001>

<bundles_post_ra>
// kernel: tpu_custom_call.1
= control target key start
LH: loop header
LB: loop body
LE: loop exit
PB: predicated region body
PF: predicated region fallthrough
CT: control target
= control target key end

     0   :  { %8 = vsyncpa [#allocation3], 0  ;;  %s1043_s0 = inlined_call_operand.hbm [shape: bf16[50,192], index: 0, kind: input, shape index: {}]   ;;  %s1044_s1 = inlined_call_operand.hbm [shape: bf16[192,128], index: 1, kind: input, shape index: {}]   ;;  %s1045_s2 = inlined_call_operand.vmem [shape: f32[1,128], index: 2, kind: input, shape index: {}]   ;;  %s1046_s3 = inlined_call_operand.hbm [shape: f32[50,128], index: 3, kind: output, shape index: {}]  }
   0x1   :  { %10 = vsyncpa [#allocation3 + $0x1], 0 }
   0x2   :  { %11 = vsyncpa [#allocation6], 0 }
   0x3   :  { %12 = vsyncpa [#allocation4], 0 }
   0x4   :  { %14 = vsyncpa [#allocation4 + $0x1], 0  ;;  %s818_s12 = smov 0   ;;  %s820_s13 = smov 0  }
   0x5   :  { %s822_s14 = smov 0   ;;  %s824_s15 = smov 0  }
   0x6 LB: > { %s839_s16 = sadd.s32 4294967295, %s786_s15   ;;  %s512_s17 = sadd.s32 4294967294, %s786_s15   ;;  %s786_s15 = sphi %s824_s15, %s1066_s15   ;;  %s782_s14 = sphi %s822_s14, %s1065_s14   ;;  %s778_s13 = sphi %s820_s13, %s1064_s13   ;;  %s774_s12 = sphi %s818_s12, %s1063_s12  }
   0x7   : > { %s843_s18 = sadd.s32 1, %s786_s15   ;;  %s27_s19 = sadd.s32 1, %s782_s14 }
   0x8   : > { %s24_s20 = ssub.s32 %s786_s15, %s843_s18  ;;  %p34_p0 = scmp.ne.s32.totalorder %s782_s14, %s778_s13 }
   0x9   : > { %p25_p1 = scmp.eq.s32.totalorder %s24_s20, 0  ;;  %p35_p2 = scmp.eq.s32.totalorder %s786_s15, 0 }
   0xa   : > { %p40_p3 = scmp.ne.s32.totalorder %s778_s13, %s774_s12  ;;  %p1047_p4 = scmp.eq.s32.totalorder %s839_s16, 0 }
   0xb   : > { %s855_s21 = scalar_select %p25_p1, %s782_s14, %s27_s19  }
   0xc   : > { %p857_p5 = por %p35_p2, %p34_p0  ;;  %p863_p6 = por %p1047_p4, %p40_p3 }
   0xd   : > { %p106_p7 = scmp.eq.s32.totalorder %s839_s16, 1  ;;  %p112_p8 = scmp.eq.s32.totalorder %s512_s17, 1 }
   0xe   : > { %s1050_s22 = scalar_select %p857_p5, 1, 0 }
   0xf   : > { %s1051_s23 = scalar_select %p863_p6, 1, 0 }
  0x10   : > { %p513_p9 = scmp.ge.s32.totalorder %s786_s15, 1  ;;  %p119_p10 = scmp.lt.s32.totalorder %s786_s15, 3 }
  0x11   : > { %p870_p11 = por %p106_p7, %p34_p0  ;;  %p874_p12 = por %p112_p8, %p40_p3 }
  0x12   : > { %p878_p13 = pnand %p513_p9, %p119_p10  ;;  %s788_s27 = smov [#allocation5]  }
  0x13   : > { %s1052_s24 = scalar_select %p870_p11, 1, 0 }
  0x14   : > { %s1053_s25 = scalar_select %p874_p12, 1, 0 }
  0x15   : > { %s1054_s26 = scalar_select %p878_p13, 1, 0 }
  0x16   : > { %p591_p1 = pneg %p878_p13  ;;  %s131_s28 = sshll.u32 %s788_s27, 4  ;;  %s132_s28 = int_to_ptr.vmem [resolvable:$true] %s131_s28 }
  0x17   : > { %s660_s5 = scalar_lea.hbm %s1044_s1, 1536 }
  0x18   : > { %p886_p2 = pnand %p591_p1, %p1047_p4  ;;  %p661_p0 = scmp.ne.s32.totalorder %s1044_s1, %s660_s5 }
  0x19   : > { %p667_p9 = scmp.lt.u32.totalorder %s660_s5, %s1044_s1 }
  0x1a   : > { %p662_p3 = pneg %p886_p2 }
  0x1c   : > { %p663_p7 = pnand %p662_p3, %p661_p0 }
  0x1e   : > { %p664_p8 = pneg %p663_p7 }
  0x20   : > { %p669_p10 = pnand %p667_p9, %p664_p8 }
  0x22   : > { %672 = shalt.err (!%p669_p10)
}
  0x23   : > { %s673_s10 = scalar_lea.vmem %s132_s28, 1536  ;;  %p681_p11 = scmp.lt.s32.totalorder %s132_s28, %s132_s28 }
  0x24   : > { %p674_p1 = scmp.ne.s32.totalorder %s132_s28, %s673_s10  ;;  %p682_p6 = scmp.lt.s32.totalorder %s673_s10, %s673_s10 }
  0x26   : > { %p676_p4 = pnand %p674_p1, %p662_p3  ;;  %p683_p13 = por %p682_p6, %p681_p11 }
  0x28   : > { %p677_p12 = pneg %p676_p4 }
  0x2a   : > { %p684_p5 = pnand %p683_p13, %p677_p12 }
  0x2c   : > { %687 = shalt.err (!%p684_p5)
}
  0x2d   : > { %s789_s11 = smov 64   ;;  %s790_s17 = smov 4  }
  0x2e   : > { %594 = dma.hbm_to_vmem [thread:$0]  (!%p886_p2), %s1044_s1, 1536, %s132_s28, [#allocation6], %s789_s11, %s789_s11, %s790_s17  }
  0x2f   : > { %p515_p0 = scmp.ge.s32.totalorder %s786_s15, 2 }
  0x30   : > { %p1056_p4 = scmp.ne.s32.totalorder (!%p515_p0), %s1050_s22, 0 }
  0x31   : > { %144 = sbr.rel (%p515_p0) target bundleno = 91 (0x5b), region = 24 }
  0x38   : > { %147 = sbr.rel (!%p1056_p4) target bundleno = 91 (0x5b), region = 28  ;;  %s148_s27 = sand.u32 (%p1056_p4), 1, %s782_s14  }
  0x39   : > { %s517_s30 = sshll.u32 (%p1056_p4), %s786_s15, 2  ;;  %s516_s4 = sshll.u32 (%p1056_p4), %s148_s27, 5 }
  0x3a   : > { %s154_s5 = ssub.s32 (%p1056_p4), 7, %s517_s30  ;;  %s916_s6 = scalar_lea.sflag (%p1056_p4), [#allocation3], %s148_s27 }
  0x3b   : > { %p155_p5 = scmp.lt.s32.totalorder (%p1056_p4), %s154_s5, 4  ;;  %s152_s7 = scalar_lea.vmem (%p1056_p4), [#allocation2], %s516_s4 }
  0x3f   : > { %s1068_s5 = smov (!%p155_p5, %s154_s5), 4 }
  0x40   : > { %s913_s29 = sshll.u32 %s1068_s5, 7 }
  0x41   : > { %s160_s28 = ssub.s32 512, %s913_s29 }
  0x42   : > { %161 = vsyncadd %s916_s6, %s160_s28  ;;  %p520_p6 = scmp.ne.s32.totalorder %s913_s29, 0  ;;  %s559_s22 = sshll.u32 %s786_s15, 9 }
  0x43   : > { %s924_s10 = scalar_lea.hbm %s1043_s0, %s559_s22  ;;  %s167_s11 = sshll.u32 %s152_s7, 4  ;;  %s926_s11 = int_to_ptr.vmem [resolvable:$true] %s167_s11 }
  0x44   : > { %s688_s17 = scalar_lea.hbm %s924_s10, %s913_s29  ;;  %s692_s27 = scalar_lea.hbm %s1043_s0, 896 }
  0x45   : > { %p689_p11 = scmp.ne.s32.totalorder %s924_s10, %s688_s17  ;;  %p693_p2 = scmp.lt.u32.totalorder %s924_s10, %s1043_s0 }
  0x46   : > { %p694_p3 = scmp.lt.u32.totalorder %s692_s27, %s688_s17  ;;  %p696_p8 = scmp.lt.u32.totalorder %s688_s17, %s924_s10 }
  0x47   : > { %p690_p12 = pnand %p689_p11, %p520_p6 }
  0x48   : > { %p695_p7 = por %p694_p3, %p693_p2 }
  0x49   : > { %p691_p13 = pneg %p690_p12 }
  0x4a   : > { %p697_p9 = por %p696_p8, %p695_p7 }
  0x4c   : > { %p698_p10 = pnand %p697_p9, %p691_p13 }
  0x4e   : > { %701 = shalt.err (!%p698_p10)
}
  0x4f   : > { %s702_s5 = scalar_lea.vmem %s926_s11, %s913_s29  ;;  %s791_s28 = smov [#allocation2]  }
  0x50   : > { %p703_p1 = scmp.ne.s32.totalorder %s926_s11, %s702_s5  ;;  %s706_s7 = sshll.u32 %s791_s28, 4  ;;  %s707_s7 = int_to_ptr.vmem [resolvable:$false] %s706_s7 }
  0x51   : > { %s708_s22 = scalar_lea.vmem %s707_s7, 1024  ;;  %p709_p11 = scmp.lt.s32.totalorder %s926_s11, %s707_s7 }
  0x52   : > { %p704_p4 = pnand %p703_p1, %p520_p6  ;;  %p710_p12 = scmp.lt.s32.totalorder %s708_s22, %s702_s5 }
  0x54   : > { %p705_p5 = pneg %p704_p4  ;;  %p711_p2 = por %p710_p12, %p709_p11 }
  0x56   : > { %p712_p3 = pnand %p711_p2, %p705_p5 }
  0x58   : > { %715 = shalt.err (!%p712_p3)
}
  0x59   : > { %s792_s8 = smov 128   ;;  %s793_s9 = smov 8  }
  0x5a   : > { %173 = dma.hbm_to_vmem [thread:$0]  (%p520_p6), %s924_s10, %s913_s29, %s926_s11, %s916_s6, %s792_s8, %s792_s8, %s793_s9  }
  0x5b PF: > { %p1057_p13 = scmp.ne.s32.totalorder %s1054_s26, 0 }
  0x5c   : > { %s956_s17 = sand.u32 (!%p1057_p13), 1, %s778_s13   ;;  %p1058_p7 = scmp.ne.s32.totalorder (!%p1057_p13), %s1051_s23, 0 }
  0x5d   : > { %179 = sbr.rel (%p1057_p13) target bundleno = 398 (0x18e), region = 32  ;;  %s526_s19 = sshll.u32 (!%p1057_p13), %s956_s17, 5 }
  0x5e   : > { %s182_s20 = scalar_lea.sflag (!%p1057_p13), [#allocation3], %s956_s17  ;;  %s962_s27 = scalar_lea.vmem (!%p1057_p13), [#allocation2], %s526_s19 }
  0x64   : > { %761 = dma.done.wait (%p1058_p7), %s182_s20, 512  }
  0x65   : > { %763 = vsyncadd (%p1058_p7), %s182_s20, 4294966784  ;;  %p1059_p6 = scmp.eq.s32.totalorder %s839_s16, 0 }
  0x67   : > { %765 = dma.done.wait (%p1059_p6), [#allocation6], 1536   ;;  %p1060_p8 = pmov %p1059_p6 }
  0x68   : > { %v794_v0 = vmov 0   ;;  %v642_v1 = vld [vmem:[#allocation5] sm:$0xff]   ;;  %v643_v2 = vld [vmem:[#allocation5 + $0x8] sm:$0xff]   ;;  %v644_v3 = vld [vmem:[#allocation5 + $0x10] sm:$0xff]   ;;  %vm349_vm0 = vcmask 523264   ;;  %s211_s29 = scalar_lea.vmem [#allocation7], %s526_s19 }
  0x69   : > { %767 = vsyncadd (%p1060_p8), [#allocation6], 4294965760  ;;  %356 = vmatprep.subr.bf16.mxu0 %v794_v0  ;;  %561 = vmatprep.subr.bf16.mxu1 %v794_v0  ;;  %v645_v4 = vld [vmem:[#allocation5 + $0x18] sm:$0xff]   ;;  %v656_v5 = vld [vmem:[%s962_s27 + $0x4] ss:$8 sps:$4 sm:$0xff]   ;;  %s410_s6 = scalar_lea.sflag [#allocation4], %s956_s17 }
  0x6a   : > { %357 = vmatpush1.bf16.msra.mxu0 %v642_v1  ;;  %573 = vmatpush1.bf16.msra.mxu1 %v642_v1  ;;  %v646_v6 = vld [vmem:[#allocation5 + $0x20] sm:$0xff]   ;;  %v659_v7 = vld [vmem:[%s962_s27 + $0x14] ss:$8 sps:$4 sm:$0xff]   ;;  %v647_v8 = vld [vmem:[#allocation5 + $0x28] sm:$0xff]   ;;  %p1061_p9 = scmp.ne.s32.totalorder %s1052_s24, 0 }
  0x6b   : > { %358 = vmatprep.subr.bf16.mxu0 %v794_v0  ;;  %562 = vmatprep.subr.bf16.mxu1 %v794_v0  ;;  %v648_v9 = vld [vmem:[#allocation5 + $0x30] sm:$0xff]   ;;  %v649_v10 = vld [vmem:[#allocation5 + $0x38] sm:$0xff]   ;;  %v650_v11 = vld [vmem:[#allocation5 + $0x40] sm:$0xff]   ;;  %s549_s10 = sshll.u32 (%p1061_p9), %s839_s16, 2 }
  0x6c   : > { %546 = vmatprep.mubr.msk.bf16.mxu0 %vm349_vm0, %v656_v5  ;;  %547 = vmatprep.mubr.msk.bf16.mxu1 %vm349_vm0, %v659_v7  ;;  %v651_v12 = vld [vmem:[#allocation5 + $0x48] sm:$0xff]   ;;  %v652_v13 = vld [vmem:[#allocation5 + $0x50] sm:$0xff]   ;;  %v653_v14 = vld [vmem:[#allocation5 + $0x58] sm:$0xff]   ;;  %s418_s11 = ssub.s32 (%p1061_p9), 7, %s549_s10 }
  0x6d   : > { %v654_v15 = vld [vmem:[%s962_s27] ss:$8 sps:$4 sm:$0xff]   ;;  %v657_v16 = vld [vmem:[%s962_s27 + $0x10] ss:$8 sps:$4 sm:$0xff]   ;;  %p419_p10 = scmp.lt.s32.totalorder (%p1061_p9), %s418_s11, 4 }
  0x6e   : > { %359 = vmatpush1.bf16.msra.mxu0 %v643_v2  ;;  %574 = vmatpush1.bf16.msra.mxu1 %v643_v2  ;;  %v529_v17 = vld [vmem:[%s1045_s2] ss:$0 sm:$0xff] }
  0x6f   : > { %360 = vmatprep.subr.bf16.mxu0 %v794_v0  ;;  %563 = vmatprep.subr.bf16.mxu1 %v794_v0 }
  0x72   : > { %361 = vmatpush1.bf16.msra.mxu0 %v644_v3  ;;  %575 = vmatpush1.bf16.msra.mxu1 %v644_v3 }
  0x73   : > { %362 = vmatprep.subr.bf16.mxu0 %v794_v0  ;;  %564 = vmatprep.subr.bf16.mxu1 %v794_v0 }
  0x76   : > { %363 = vmatpush1.bf16.msra.mxu0 %v645_v4  ;;  %576 = vmatpush1.bf16.msra.mxu1 %v645_v4 }
  0x77   : > { %364 = vmatprep.subr.bf16.mxu0 %v794_v0  ;;  %565 = vmatprep.subr.bf16.mxu1 %v794_v0 }
  0x7a   : > { %365 = vmatpush1.bf16.msra.mxu0 %v646_v6  ;;  %577 = vmatpush1.bf16.msra.mxu1 %v646_v6 }
  0x7b   : > { %366 = vmatprep.subr.bf16.mxu0 %v794_v0  ;;  %566 = vmatprep.subr.bf16.mxu1 %v794_v0 }
  0x7e   : > { %367 = vmatpush1.bf16.msra.mxu0 %v647_v8  ;;  %578 = vmatpush1.bf16.msra.mxu1 %v647_v8 }
  0x7f   : > { %368 = vmatprep.subr.bf16.mxu0 %v794_v0  ;;  %567 = vmatprep.subr.bf16.mxu1 %v794_v0 }
  0x82   : > { %369 = vmatpush1.bf16.msra.mxu0 %v648_v9  ;;  %579 = vmatpush1.bf16.msra.mxu1 %v648_v9 }
  0x83   : > { %370 = vmatprep.subr.bf16.mxu0 %v794_v0  ;;  %568 = vmatprep.subr.bf16.mxu1 %v794_v0 }
  0x86   : > { %371 = vmatpush1.bf16.msra.mxu0 %v649_v10  ;;  %580 = vmatpush1.bf16.msra.mxu1 %v649_v10 }
  0x87   : > { %372 = vmatprep.subr.bf16.mxu0 %v794_v0  ;;  %569 = vmatprep.subr.bf16.mxu1 %v794_v0 }
  0x8a   : > { %373 = vmatpush1.bf16.msra.mxu0 %v650_v11  ;;  %581 = vmatpush1.bf16.msra.mxu1 %v650_v11 }
  0x8b   : > { %374 = vmatprep.subr.bf16.mxu0 %v794_v0  ;;  %570 = vmatprep.subr.bf16.mxu1 %v794_v0 }
  0x8e   : > { %375 = vmatpush1.bf16.msra.mxu0 %v651_v12  ;;  %582 = vmatpush1.bf16.msra.mxu1 %v651_v12 }
  0x8f   : > { %376 = vmatprep.subr.bf16.mxu0 %v794_v0  ;;  %571 = vmatprep.subr.bf16.mxu1 %v794_v0 }
  0x92   : > { %377 = vmatpush1.bf16.msra.mxu0 %v652_v13  ;;  %583 = vmatpush1.bf16.msra.mxu1 %v652_v13 }
  0x93   : > { %378 = vmatprep.subr.bf16.mxu0 %v794_v0  ;;  %572 = vmatprep.subr.bf16.mxu1 %v794_v0 }
  0x96   : > { %379 = vmatpush1.bf16.msra.mxu0 %v653_v14  ;;  %584 = vmatpush1.bf16.msra.mxu1 %v653_v14 }
  0x99   : > { %389 = vmatmul.mubr.bf16.vlgmr.msra.gmra.mrb[0].mxu0 %v654_v15  ;;  %397 = vmatmul.mubr.bf16.vlgmr.msra.gmra.mrb[0].mxu1 %v657_v16 }
 0x16b   : > { %416 = sbr.rel (!%p1061_p9) target bundleno = 398 (0x18e), region = 44 }
 0x16c   : > { %v390_v18 = vpop.f32.mrb[0].mxu0  ;;  %v398_v19 = vpop.f32.mrb[0].mxu1 }
 0x16d   : > { %v391_v20 = vadd.f32 %v529_v17, %v390_v18  ;;  %v399_v21 = vadd.f32 %v529_v17, %v398_v19  ;;  %v392_v22 = vpop.f32.mrb[1].mxu0  ;;  %v400_v23 = vpop.f32.mrb[1].mxu1 }
 0x16e   : > { %v393_v24 = vpop.f32.mrb[2].mxu0  ;;  %v401_v25 = vpop.f32.mrb[2].mxu1 }
 0x16f   : > { %405 = vst [vmem:[%s211_s29] sm:$0xff] %v391_v20  ;;  %407 = vst [vmem:[%s211_s29 + $0x10] sm:$0xff] %v399_v21  ;;  %v394_v26 = vadd.f32 %v529_v17, %v393_v24  ;;  %v402_v27 = vadd.f32 %v529_v17, %v401_v25  ;;  %v395_v28 = vpop.f32.mrb[3].mxu0  ;;  %v403_v29 = vpop.f32.mrb[3].mxu1 }
 0x171   : > { %406 = vst [vmem:[%s211_s29 + $0x8] sm:$0xff] %v394_v26  ;;  %408 = vst [vmem:[%s211_s29 + $0x18] sm:$0xff] %v402_v27 }
 0x172   : > { %s1070_s11 = smov (!%p419_p10, %s418_s11), 4 }
 0x173   : > { %s985_s30 = sshll.u32 %s1070_s11, 7 }
 0x174   : > { %s423_s4 = ssub.s32 512, %s985_s30 }
 0x175   : > { %424 = vsyncadd %s410_s6, %s423_s4  ;;  %p551_p1 = scmp.ne.s32.totalorder %s985_s30, 0  ;;  %s560_s5 = sshll.u32 %s839_s16, 9 }
 0x176   : > { %s995_s7 = scalar_lea.hbm %s1046_s3, %s560_s5  ;;  %s429_s22 = sshll.u32 %s211_s29, 4  ;;  %s997_s22 = int_to_ptr.vmem [resolvable:$true] %s429_s22 }
 0x177   : > { %s716_s8 = scalar_lea.vmem %s997_s22, %s985_s30  ;;  %s795_s9 = smov [#allocation7]  }
 0x178   : > { %p717_p4 = scmp.ne.s32.totalorder %s997_s22, %s716_s8  ;;  %s720_s19 = sshll.u32 %s795_s9, 4  ;;  %s721_s19 = int_to_ptr.vmem [resolvable:$false] %s720_s19 }
 0x179   : > { %s722_s16 = scalar_lea.vmem %s721_s19, 1024  ;;  %p723_p12 = scmp.lt.s32.totalorder %s997_s22, %s721_s19 }
 0x17a   : > { %p718_p5 = pnand %p717_p4, %p551_p1  ;;  %p724_p2 = scmp.lt.s32.totalorder %s722_s16, %s716_s8 }
 0x17c   : > { %p719_p11 = pneg %p718_p5  ;;  %p725_p3 = por %p724_p2, %p723_p12 }
 0x17e   : > { %p726_p13 = pnand %p725_p3, %p719_p11 }
 0x180   : > { %729 = shalt.err (!%p726_p13)
}
 0x181   : > { %s730_s20 = scalar_lea.hbm %s995_s7, %s985_s30  ;;  %s734_s26 = scalar_lea.hbm %s1046_s3, 896 }
 0x182   : > { %p731_p7 = scmp.ne.s32.totalorder %s995_s7, %s730_s20  ;;  %p735_p9 = scmp.lt.u32.totalorder %s995_s7, %s1046_s3 }
 0x183   : > { %p736_p10 = scmp.lt.u32.totalorder %s734_s26, %s730_s20  ;;  %p738_p5 = scmp.lt.u32.totalorder %s730_s20, %s995_s7 }
 0x184   : > { %p732_p6 = pnand %p731_p7, %p551_p1 }
 0x185   : > { %p737_p4 = por %p736_p10, %p735_p9 }
 0x186   : > { %p733_p8 = pneg %p732_p6 }
 0x187   : > { %p739_p11 = por %p738_p5, %p737_p4 }
 0x189   : > { %p740_p12 = pnand %p739_p11, %p733_p8 }
 0x18b   : > { %743 = shalt.err (!%p740_p12)
}
 0x18c   : > { %s796_s11 = smov 128   ;;  %s797_s4 = smov 8  }
 0x18d   : > { %435 = dma.vmem_to_hbm [thread:$0]  (%p551_p1), %s997_s22, %s985_s30, %s995_s7, %s410_s6, %s796_s11, %s796_s11, %s797_s4  }
 0x18e PF: > { %s444_s5 = sand.u32 1, %s774_s12   ;;  %p1062_p2 = scmp.ne.s32.totalorder %s1053_s25, 0 }
 0x18f   : > { %s445_s24 = scalar_lea.sflag [#allocation4], %s444_s5 }
 0x190   : > { %p596_p3 = pnand %p515_p0, %p1062_p2 }
 0x192   : > { %769 = dma.done.wait (!%p596_p3), %s445_s24, 512  }
 0x193   : > { %771 = vsyncadd (!%p596_p3), %s445_s24, 4294966784  ;;  %p17_p13 = scmp.ge.s32.totalorder %s843_s18, 4   ;;  %s1063_s12 = smov %s778_s13 }
 0x194   : > { %s1064_s13 = smov %s782_s14  ;;  %s1065_s14 = smov %s855_s21 }
 0x195   : > { %s1066_s15 = smov %s843_s18  ;;  %19 = sbr.rel (!%p17_p13) target bundleno = 6 (0x6), region = 81 }
 0x19c   :  { %450 = vsyncpa [#allocation3], 1 }
 0x19d   :  { %452 = vsyncpa [#allocation3 + $0x1], 1 }
 0x19e   :  { %453 = vsyncpa [#allocation6], 1 }
 0x19f   :  { %454 = vsyncpa [#allocation4], 1 }
 0x1a0   :  { %456 = vsyncpa [#allocation4 + $0x1], 1 }

</bundles_post_ra>
